<compile_context>
chip_gen: v7x
topology: tpu7x:2x2x1
jax: 0.10.0
libtpu: 0.0.40
codegen_flags: <defaults>
</compile_context>

<pallas_src>
import jax
import jax.numpy as jnp
from jax.experimental import pallas as pl
from jax.experimental.pallas import tpu as pltpu

# (kernel_size, dilation, padding) for conv1, conv3, conv2_2, conv3_2, conv4_2.
CONV_SPECS = (
    (1, 1, 0),
    (3, 1, 1),
    (2, 2, 1),
    (3, 2, 2),
    (4, 2, 3),
)
N_OUT_CH = len(CONV_SPECS)
# Flat weight layout: each conv's (1, 1, K) weight flattened and concatenated in
# CONV_SPECS order (conv1, conv3, conv2_2, conv3_2, conv4_2).
N_WEIGHTS = sum(k for (k, _, _) in CONV_SPECS)  # 1 + 3 + 2 + 3 + 4 = 13


def _round_up(a: int, b: int) -> int:
    return ((a + b - 1) // b) * b


def _header_encoder_kernel(w_ref, b_ref, x_ref, out_ref):
    """w_ref: SMEM (13,), b_ref: SMEM (5,), x_ref: VMEM (block_n, L), out_ref: VMEM (5, block_n, L)."""
    x = x_ref[...]                                        # (block_n, L) f32
    bn, L = x.shape
    col = jax.lax.broadcasted_iota(jnp.int32, (bn, L), 1)

    def tap(d):
        # tap(d)[:, t] == x[:, t + d] if 0 <= t + d < L else 0   (conv zero padding).
        if d == 0:
            return x
        rolled = pltpu.roll(x, (-d) % L, axis=1)          # rolled[:, t] = x[:, (t + d) % L]
        valid = (col < L - d) if d > 0 else (col >= -d)
        return jnp.where(valid, rolled, 0.0)

    widx = 0
    for c, (K, dil, pad) in enumerate(CONV_SPECS):
        # PyTorch Conv1d (cross-correlation): out[t] = b + sum_k w[k] * x[t + k*dil - pad].
        acc = w_ref[widx] * tap(-pad) + b_ref[c]          # init from first tap (k == 0)
        for k in range(1, K):
            acc = acc + w_ref[widx + k] * tap(k * dil - pad)
        out_ref[c, :, :] = acc                            # dense (block_n, L) store
        widx += K


def header_encoder(x, weights, biases, *, block_n=None):
    """x: (N, 1, L) f32; weights: (13,) flat conv weights (CONV_SPECS order); biases: (5,).

    Returns (N, 5, L) f32, matching torch.cat([conv_i(x) for ...], dim=1).
    """
    n, cin, L = x.shape
    assert cin == 1
    assert weights.shape == (N_WEIGHTS,) and biases.shape == (N_OUT_CH,)

    # Lane-align the sequence dim (also keeps in-kernel rolls on 128-multiple minor
    # dims). The extra zero columns reproduce the convs' own zero padding, so all
    # outputs at t < L are unaffected; padded rows/cols are sliced off below.
    L_pad = max(128, _round_up(L, 128))

    if block_n is None:
        # ~24 B of HBM traffic per (n, t) element (4 B in + 20 B out, f32).
        # Target ~2 MiB per grid step; x2 double-buffering stays far below
        # v7x's 64 MiB VMEM (and v5e/v6e's 128 MiB).
        rows = (2 * 1024 * 1024) // (24 * L_pad)
        block_n = max(8, min(512, (rows // 8) * 8))
    block_n = _round_up(max(1, int(block_n)), 8)          # dense sublanes
    block_n = min(block_n, _round_up(n, 8))
    n_pad = _round_up(n, block_n)

    x2d = x[:, 0, :]                                      # (N, L): no +/-3 halo pad in HBM
    if (n_pad, L_pad) != (n, L):
        x2d = jnp.pad(x2d, ((0, n_pad - n), (0, L_pad - L)))

    grid = (n_pad // block_n,)

    out_cmaj = pl.pallas_call(
        _header_encoder_kernel,
        grid=grid,
        out_shape=jax.ShapeDtypeStruct((N_OUT_CH, n_pad, L_pad), jnp.float32),
        in_specs=[
            pl.BlockSpec(memory_space=pltpu.MemorySpace.SMEM),      # weights (13,) scalars
            pl.BlockSpec(memory_space=pltpu.MemorySpace.SMEM),      # biases  (5,)  scalars
            pl.BlockSpec((block_n, L_pad), lambda i: (i, 0)),       # input batch tile
        ],
        out_specs=pl.BlockSpec((N_OUT_CH, block_n, L_pad), lambda i: (0, i, 0)),
        compiler_params=pltpu.CompilerParams(
            dimension_semantics=("parallel",),     # batch tiles independent -> megacore OK
            vmem_limit_bytes=48 * 1024 * 1024,     # explicit headroom, < v7x's 64 MiB VMEM
        ),
    )(weights, biases, x2d)

    # Kernel output is channel-major for dense stores; hand back the module's NCL layout.
    return jnp.transpose(out_cmaj[:, :n, :L], (1, 0, 2))


def _reference(x, weights, biases):
    """Pure-JAX reference identical to the PyTorch forward (lax conv, NCH layout)."""
    outs = []
    widx = 0
    for c, (K, dil, pad) in enumerate(CONV_SPECS):
        w = weights[widx:widx + K].reshape(1, 1, K)       # (O, I, K)
        o = jax.lax.conv_general_dilated(
            x, w, window_strides=(1,), padding=[(pad, pad)],
            rhs_dilation=(dil,), dimension_numbers=("NCH", "OIH", "NCH"))
        outs.append(o + biases[c])
        widx += K
    return jnp.concatenate(outs, axis=1)                  # (N, 5, L)


if __name__ == "__main__":
    key = jax.random.PRNGKey(0)
    k_x, k_w, k_b, k_x2 = jax.random.split(key, 4)

    # Deterministic synthetic parameters (shapes from nn.Conv1d(1, 1, K) layers).
    weights = jax.random.normal(k_w, (N_WEIGHTS,), dtype=jnp.float32) * 0.5
    biases = jax.random.normal(k_b, (N_OUT_CH,), dtype=jnp.float32) * 0.1

    # Small, tile-aligned shapes; block_n=8 gives a 2-step "parallel" batch grid.
    N, L = 16, 256
    x = jax.random.normal(k_x, (N, 1, L), dtype=jnp.float32)
    out = jax.block_until_ready(header_encoder(x, weights, biases, block_n=8))
    ref = _reference(x, weights, biases)
    assert out.shape == (N, N_OUT_CH, L), out.shape
    assert jnp.allclose(out, ref, atol=1e-5, rtol=1e-5), float(jnp.max(jnp.abs(out - ref)))

    # Ragged shapes (batch/seq not multiples of 8/128) exercise the padding path.
    N2, L2 = 5, 96
    x2 = jax.random.normal(k_x2, (N2, 1, L2), dtype=jnp.float32)
    out2 = jax.block_until_ready(header_encoder(x2, weights, biases))
    ref2 = _reference(x2, weights, biases)
    assert out2.shape == (N2, N_OUT_CH, L2), out2.shape
    assert jnp.allclose(out2, ref2, atol=1e-5, rtol=1e-5), float(jnp.max(jnp.abs(out2 - ref2)))

    print("KERNEL_OK")
</pallas_src>

<mosaic_0001>
module attributes {stable_mosaic.version = 11 : i64} {
  func.func @_header_encoder_kernel(%arg0: i32, %arg1: memref<13xf32, #tpu.memory_space<smem>>, %arg2: memref<5xf32, #tpu.memory_space<smem>>, %arg3: memref<8x256xf32, #tpu.memory_space<vmem>>, %arg4: memref<5x8x256xf32, #tpu.memory_space<vmem>>) attributes {dimension_semantics = [#tpu.dimension_semantics<parallel>], iteration_bounds = array<i64: 2>, scalar_prefetch = 0 : i64, scratch_operands = 0 : i64, tpu.core_type = #tpu.core_type<tc>, window_params = [{transform_indices = @transform_0, window_bounds = array<i64: 13>}, {transform_indices = @transform_1, window_bounds = array<i64: 5>}, {transform_indices = @transform_2, window_bounds = array<i64: 8, 256>}, {transform_indices = @transform_3, window_bounds = array<i64: 5, 8, 256>}]} {
    %c0 = arith.constant 0 : index
    %c0_0 = arith.constant 0 : index
    %0 = vector.load %arg3[%c0, %c0_0] : memref<8x256xf32, #tpu.memory_space<vmem>>, vector<8x256xf32>
    %1 = tpu.iota {dimensions = array<i32: 1>} : vector<8x256xi32>
    %c0_1 = arith.constant 0 : index
    %2 = memref.load %arg1[%c0_1] : memref<13xf32, #tpu.memory_space<smem>>
    %3 = vector.broadcast %2 : f32 to vector<8x256xf32>
    %4 = arith.mulf %3, %0 : vector<8x256xf32>
    %c0_2 = arith.constant 0 : index
    %5 = memref.load %arg2[%c0_2] : memref<5xf32, #tpu.memory_space<smem>>
    %6 = vector.broadcast %5 : f32 to vector<8x256xf32>
    %7 = arith.addf %4, %6 : vector<8x256xf32>
    %c0_3 = arith.constant 0 : index
    %c0_4 = arith.constant 0 : index
    %c0_5 = arith.constant 0 : index
    %8 = vector.load %arg4[%c0_3, %c0_4, %c0_5] : memref<5x8x256xf32, #tpu.memory_space<vmem>>, vector<1x8x256xf32>
    %9 = vector.shape_cast %8 : vector<1x8x256xf32> to vector<8x256xf32>
    %10 = vector.shape_cast %7 : vector<8x256xf32> to vector<1x8x256xf32>
    tpu.vector_store %arg4[%c0_3, %c0_4, %c0_5], %10 {strides = array<i32>} : memref<5x8x256xf32, #tpu.memory_space<vmem>>, vector<1x8x256xf32>,
    %c1 = arith.constant 1 : index
    %11 = memref.load %arg1[%c1] : memref<13xf32, #tpu.memory_space<smem>>
    %c1_i32 = arith.constant 1 : i32
    %12 = tpu.dynamic_rotate %0 by %c1_i32 dim 1 : vector<8x256xf32>, i32 -> vector<8x256xf32>
    %c1_i32_6 = arith.constant 1 : i32
    %13 = vector.broadcast %c1_i32_6 : i32 to vector<8x256xi32>
    %14 = arith.cmpi sge, %1, %13 : vector<8x256xi32>
    %cst = arith.constant 0.000000e+00 : f32
    %15 = vector.broadcast %cst : f32 to vector<8x256xf32>
    %16 = arith.select %14, %12, %15 : vector<8x256xi1>, vector<8x256xf32>
    %17 = vector.broadcast %11 : f32 to vector<8x256xf32>
    %18 = arith.mulf %17, %16 : vector<8x256xf32>
    %c1_7 = arith.constant 1 : index
    %19 = memref.load %arg2[%c1_7] : memref<5xf32, #tpu.memory_space<smem>>
    %20 = vector.broadcast %19 : f32 to vector<8x256xf32>
    %21 = arith.addf %18, %20 : vector<8x256xf32>
    %c2 = arith.constant 2 : index
    %22 = memref.load %arg1[%c2] : memref<13xf32, #tpu.memory_space<smem>>
    %23 = vector.broadcast %22 : f32 to vector<8x256xf32>
    %24 = arith.mulf %23, %0 : vector<8x256xf32>
    %25 = arith.addf %21, %24 : vector<8x256xf32>
    %c3 = arith.constant 3 : index
    %26 = memref.load %arg1[%c3] : memref<13xf32, #tpu.memory_space<smem>>
    %c255_i32 = arith.constant 255 : i32
    %27 = tpu.dynamic_rotate %0 by %c255_i32 dim 1 : vector<8x256xf32>, i32 -> vector<8x256xf32>
    %c255_i32_8 = arith.constant 255 : i32
    %28 = vector.broadcast %c255_i32_8 : i32 to vector<8x256xi32>
    %29 = arith.cmpi slt, %1, %28 : vector<8x256xi32>
    %cst_9 = arith.constant 0.000000e+00 : f32
    %30 = vector.broadcast %cst_9 : f32 to vector<8x256xf32>
    %31 = arith.select %29, %27, %30 : vector<8x256xi1>, vector<8x256xf32>
    %32 = vector.broadcast %26 : f32 to vector<8x256xf32>
    %33 = arith.mulf %32, %31 : vector<8x256xf32>
    %34 = arith.addf %25, %33 : vector<8x256xf32>
    %c1_10 = arith.constant 1 : index
    %c0_11 = arith.constant 0 : index
    %c0_12 = arith.constant 0 : index
    %35 = vector.load %arg4[%c1_10, %c0_11, %c0_12] : memref<5x8x256xf32, #tpu.memory_space<vmem>>, vector<1x8x256xf32>
    %36 = vector.shape_cast %35 : vector<1x8x256xf32> to vector<8x256xf32>
    %37 = vector.shape_cast %34 : vector<8x256xf32> to vector<1x8x256xf32>
    tpu.vector_store %arg4[%c1_10, %c0_11, %c0_12], %37 {strides = array<i32>} : memref<5x8x256xf32, #tpu.memory_space<vmem>>, vector<1x8x256xf32>,
    %c4 = arith.constant 4 : index
    %38 = memref.load %arg1[%c4] : memref<13xf32, #tpu.memory_space<smem>>
    %c1_i32_13 = arith.constant 1 : i32
    %39 = tpu.dynamic_rotate %0 by %c1_i32_13 dim 1 : vector<8x256xf32>, i32 -> vector<8x256xf32>
    %c1_i32_14 = arith.constant 1 : i32
    %40 = vector.broadcast %c1_i32_14 : i32 to vector<8x256xi32>
    %41 = arith.cmpi sge, %1, %40 : vector<8x256xi32>
    %cst_15 = arith.constant 0.000000e+00 : f32
    %42 = vector.broadcast %cst_15 : f32 to vector<8x256xf32>
    %43 = arith.select %41, %39, %42 : vector<8x256xi1>, vector<8x256xf32>
    %44 = vector.broadcast %38 : f32 to vector<8x256xf32>
    %45 = arith.mulf %44, %43 : vector<8x256xf32>
    %c2_16 = arith.constant 2 : index
    %46 = memref.load %arg2[%c2_16] : memref<5xf32, #tpu.memory_space<smem>>
    %47 = vector.broadcast %46 : f32 to vector<8x256xf32>
    %48 = arith.addf %45, %47 : vector<8x256xf32>
    %c5 = arith.constant 5 : index
    %49 = memref.load %arg1[%c5] : memref<13xf32, #tpu.memory_space<smem>>
    %c255_i32_17 = arith.constant 255 : i32
    %50 = tpu.dynamic_rotate %0 by %c255_i32_17 dim 1 : vector<8x256xf32>, i32 -> vector<8x256xf32>
    %c255_i32_18 = arith.constant 255 : i32
    %51 = vector.broadcast %c255_i32_18 : i32 to vector<8x256xi32>
    %52 = arith.cmpi slt, %1, %51 : vector<8x256xi32>
    %cst_19 = arith.constant 0.000000e+00 : f32
    %53 = vector.broadcast %cst_19 : f32 to vector<8x256xf32>
    %54 = arith.select %52, %50, %53 : vector<8x256xi1>, vector<8x256xf32>
    %55 = vector.broadcast %49 : f32 to vector<8x256xf32>
    %56 = arith.mulf %55, %54 : vector<8x256xf32>
    %57 = arith.addf %48, %56 : vector<8x256xf32>
    %c2_20 = arith.constant 2 : index
    %c0_21 = arith.constant 0 : index
    %c0_22 = arith.constant 0 : index
    %58 = vector.load %arg4[%c2_20, %c0_21, %c0_22] : memref<5x8x256xf32, #tpu.memory_space<vmem>>, vector<1x8x256xf32>
    %59 = vector.shape_cast %58 : vector<1x8x256xf32> to vector<8x256xf32>
    %60 = vector.shape_cast %57 : vector<8x256xf32> to vector<1x8x256xf32>
    tpu.vector_store %arg4[%c2_20, %c0_21, %c0_22], %60 {strides = array<i32>} : memref<5x8x256xf32, #tpu.memory_space<vmem>>, vector<1x8x256xf32>,
    %c6 = arith.constant 6 : index
    %61 = memref.load %arg1[%c6] : memref<13xf32, #tpu.memory_space<smem>>
    %c2_i32 = arith.constant 2 : i32
    %62 = tpu.dynamic_rotate %0 by %c2_i32 dim 1 : vector<8x256xf32>, i32 -> vector<8x256xf32>
    %c2_i32_23 = arith.constant 2 : i32
    %63 = vector.broadcast %c2_i32_23 : i32 to vector<8x256xi32>
    %64 = arith.cmpi sge, %1, %63 : vector<8x256xi32>
    %cst_24 = arith.constant 0.000000e+00 : f32
    %65 = vector.broadcast %cst_24 : f32 to vector<8x256xf32>
    %66 = arith.select %64, %62, %65 : vector<8x256xi1>, vector<8x256xf32>
    %67 = vector.broadcast %61 : f32 to vector<8x256xf32>
    %68 = arith.mulf %67, %66 : vector<8x256xf32>
    %c3_25 = arith.constant 3 : index
    %69 = memref.load %arg2[%c3_25] : memref<5xf32, #tpu.memory_space<smem>>
    %70 = vector.broadcast %69 : f32 to vector<8x256xf32>
    %71 = arith.addf %68, %70 : vector<8x256xf32>
    %c7 = arith.constant 7 : index
    %72 = memref.load %arg1[%c7] : memref<13xf32, #tpu.memory_space<smem>>
    %73 = vector.broadcast %72 : f32 to vector<8x256xf32>
    %74 = arith.mulf %73, %0 : vector<8x256xf32>
    %75 = arith.addf %71, %74 : vector<8x256xf32>
    %c8 = arith.constant 8 : index
    %76 = memref.load %arg1[%c8] : memref<13xf32, #tpu.memory_space<smem>>
    %c254_i32 = arith.constant 254 : i32
    %77 = tpu.dynamic_rotate %0 by %c254_i32 dim 1 : vector<8x256xf32>, i32 -> vector<8x256xf32>
    %c254_i32_26 = arith.constant 254 : i32
    %78 = vector.broadcast %c254_i32_26 : i32 to vector<8x256xi32>
    %79 = arith.cmpi slt, %1, %78 : vector<8x256xi32>
    %cst_27 = arith.constant 0.000000e+00 : f32
    %80 = vector.broadcast %cst_27 : f32 to vector<8x256xf32>
    %81 = arith.select %79, %77, %80 : vector<8x256xi1>, vector<8x256xf32>
    %82 = vector.broadcast %76 : f32 to vector<8x256xf32>
    %83 = arith.mulf %82, %81 : vector<8x256xf32>
    %84 = arith.addf %75, %83 : vector<8x256xf32>
    %c3_28 = arith.constant 3 : index
    %c0_29 = arith.constant 0 : index
    %c0_30 = arith.constant 0 : index
    %85 = vector.load %arg4[%c3_28, %c0_29, %c0_30] : memref<5x8x256xf32, #tpu.memory_space<vmem>>, vector<1x8x256xf32>
    %86 = vector.shape_cast %85 : vector<1x8x256xf32> to vector<8x256xf32>
    %87 = vector.shape_cast %84 : vector<8x256xf32> to vector<1x8x256xf32>
    tpu.vector_store %arg4[%c3_28, %c0_29, %c0_30], %87 {strides = array<i32>} : memref<5x8x256xf32, #tpu.memory_space<vmem>>, vector<1x8x256xf32>,
    %c9 = arith.constant 9 : index
    %88 = memref.load %arg1[%c9] : memref<13xf32, #tpu.memory_space<smem>>
    %c3_i32 = arith.constant 3 : i32
    %89 = tpu.dynamic_rotate %0 by %c3_i32 dim 1 : vector<8x256xf32>, i32 -> vector<8x256xf32>
    %c3_i32_31 = arith.constant 3 : i32
    %90 = vector.broadcast %c3_i32_31 : i32 to vector<8x256xi32>
    %91 = arith.cmpi sge, %1, %90 : vector<8x256xi32>
    %cst_32 = arith.constant 0.000000e+00 : f32
    %92 = vector.broadcast %cst_32 : f32 to vector<8x256xf32>
    %93 = arith.select %91, %89, %92 : vector<8x256xi1>, vector<8x256xf32>
    %94 = vector.broadcast %88 : f32 to vector<8x256xf32>
    %95 = arith.mulf %94, %93 : vector<8x256xf32>
    %c4_33 = arith.constant 4 : index
    %96 = memref.load %arg2[%c4_33] : memref<5xf32, #tpu.memory_space<smem>>
    %97 = vector.broadcast %96 : f32 to vector<8x256xf32>
    %98 = arith.addf %95, %97 : vector<8x256xf32>
    %c10 = arith.constant 10 : index
    %99 = memref.load %arg1[%c10] : memref<13xf32, #tpu.memory_space<smem>>
    %c1_i32_34 = arith.constant 1 : i32
    %100 = tpu.dynamic_rotate %0 by %c1_i32_34 dim 1 : vector<8x256xf32>, i32 -> vector<8x256xf32>
    %c1_i32_35 = arith.constant 1 : i32
    %101 = vector.broadcast %c1_i32_35 : i32 to vector<8x256xi32>
    %102 = arith.cmpi sge, %1, %101 : vector<8x256xi32>
    %cst_36 = arith.constant 0.000000e+00 : f32
    %103 = vector.broadcast %cst_36 : f32 to vector<8x256xf32>
    %104 = arith.select %102, %100, %103 : vector<8x256xi1>, vector<8x256xf32>
    %105 = vector.broadcast %99 : f32 to vector<8x256xf32>
    %106 = arith.mulf %105, %104 : vector<8x256xf32>
    %107 = arith.addf %98, %106 : vector<8x256xf32>
    %c11 = arith.constant 11 : index
    %108 = memref.load %arg1[%c11] : memref<13xf32, #tpu.memory_space<smem>>
    %c255_i32_37 = arith.constant 255 : i32
    %109 = tpu.dynamic_rotate %0 by %c255_i32_37 dim 1 : vector<8x256xf32>, i32 -> vector<8x256xf32>
    %c255_i32_38 = arith.constant 255 : i32
    %110 = vector.broadcast %c255_i32_38 : i32 to vector<8x256xi32>
    %111 = arith.cmpi slt, %1, %110 : vector<8x256xi32>
    %cst_39 = arith.constant 0.000000e+00 : f32
    %112 = vector.broadcast %cst_39 : f32 to vector<8x256xf32>
    %113 = arith.select %111, %109, %112 : vector<8x256xi1>, vector<8x256xf32>
    %114 = vector.broadcast %108 : f32 to vector<8x256xf32>
    %115 = arith.mulf %114, %113 : vector<8x256xf32>
    %116 = arith.addf %107, %115 : vector<8x256xf32>
    %c12 = arith.constant 12 : index
    %117 = memref.load %arg1[%c12] : memref<13xf32, #tpu.memory_space<smem>>
    %c253_i32 = arith.constant 253 : i32
    %118 = tpu.dynamic_rotate %0 by %c253_i32 dim 1 : vector<8x256xf32>, i32 -> vector<8x256xf32>
    %c253_i32_40 = arith.constant 253 : i32
    %119 = vector.broadcast %c253_i32_40 : i32 to vector<8x256xi32>
    %120 = arith.cmpi slt, %1, %119 : vector<8x256xi32>
    %cst_41 = arith.constant 0.000000e+00 : f32
    %121 = vector.broadcast %cst_41 : f32 to vector<8x256xf32>
    %122 = arith.select %120, %118, %121 : vector<8x256xi1>, vector<8x256xf32>
    %123 = vector.broadcast %117 : f32 to vector<8x256xf32>
    %124 = arith.mulf %123, %122 : vector<8x256xf32>
    %125 = arith.addf %116, %124 : vector<8x256xf32>
    %c4_42 = arith.constant 4 : index
    %c0_43 = arith.constant 0 : index
    %c0_44 = arith.constant 0 : index
    %126 = vector.load %arg4[%c4_42, %c0_43, %c0_44] : memref<5x8x256xf32, #tpu.memory_space<vmem>>, vector<1x8x256xf32>
    %127 = vector.shape_cast %126 : vector<1x8x256xf32> to vector<8x256xf32>
    %128 = vector.shape_cast %125 : vector<8x256xf32> to vector<1x8x256xf32>
    tpu.vector_store %arg4[%c4_42, %c0_43, %c0_44], %128 {strides = array<i32>} : memref<5x8x256xf32, #tpu.memory_space<vmem>>, vector<1x8x256xf32>,
    return
  }
  func.func @transform_0(%arg0: i32) -> i32 {
    %c0_i32 = arith.constant 0 : i32
    %c0_i32_0 = arith.constant 0 : i32
    return %c0_i32 : i32
  }
  func.func @transform_1(%arg0: i32) -> i32 {
    %c0_i32 = arith.constant 0 : i32
    %c0_i32_0 = arith.constant 0 : i32
    return %c0_i32 : i32
  }
  func.func @transform_2(%arg0: i32) -> (i32, i32) {
    %c0_i32 = arith.constant 0 : i32
    %c0_i32_0 = arith.constant 0 : i32
    return %arg0, %c0_i32 : i32, i32
  }
  func.func @transform_3(%arg0: i32) -> (i32, i32, i32) {
    %c0_i32 = arith.constant 0 : i32
    %c0_i32_0 = arith.constant 0 : i32
    %c0_i32_1 = arith.constant 0 : i32
    return %c0_i32, %arg0, %c0_i32_0 : i32, i32, i32
  }
}

</mosaic_0001>

<bundles_post_ra>
// kernel: tpu_custom_call.1
= control target key start
LH: loop header
LB: loop body
LE: loop exit
PB: predicated region body
PF: predicated region fallthrough
CT: control target
= control target key end

     0   :  { %8 = vsyncpa [#allocation5], 0  ;;  %s1134_s0 = inlined_call_operand.hbm [shape: f32[13], index: 0, kind: input, shape index: {}]   ;;  %s1135_s1 = inlined_call_operand.vmem [shape: f32[5], index: 1, kind: input, shape index: {}]   ;;  %s1136_s2 = inlined_call_operand.hbm [shape: f32[16,256], index: 2, kind: input, shape index: {}]   ;;  %s1137_s3 = inlined_call_operand.hbm [shape: f32[5,16,256], index: 3, kind: output, shape index: {}]  }
   0x1   :  { %9 = vsyncpa [#allocation6], 0 }
   0x2   :  { %10 = vsyncpa [#allocation3], 0 }
   0x3   :  { %12 = vsyncpa [#allocation3 + $0x1], 0 }
   0x4   :  { %13 = vsyncpa [#allocation4], 0 }
   0x5   :  { %15 = vsyncpa [#allocation4 + $0x1], 0  ;;  %s782_s12 = smov 0   ;;  %s784_s13 = smov 0  }
   0x6   :  { %s786_s14 = smov 0   ;;  %s788_s15 = smov 0  }
   0x7 LB: > { %s803_s16 = sadd.s32 4294967295, %s747_s15   ;;  %s496_s17 = sadd.s32 4294967294, %s747_s15   ;;  %s747_s15 = sphi %s788_s15, %s1160_s15   ;;  %s743_s14 = sphi %s786_s14, %s1159_s14   ;;  %s739_s13 = sphi %s784_s13, %s1158_s13   ;;  %s735_s12 = sphi %s782_s12, %s1157_s12  }
   0x8   : > { %p83_p0 = scmp.ne.s32.totalorder %s739_s13, %s735_s12  ;;  %p1138_p1 = scmp.eq.s32.totalorder %s803_s16, 0 }
   0x9   : > { %p113_p3 = scmp.eq.s32.totalorder %s496_s17, 1  ;;  %p497_p5 = scmp.ge.s32.totalorder %s747_s15, 1 }
   0xa   : > { %p812_p4 = por %p1138_p1, %p83_p0  ;;  %p120_p7 = scmp.lt.s32.totalorder %s747_s15, 3 }
   0xb   : > { %p817_p6 = por %p113_p3, %p83_p0  ;;  %s142_s23 = sshll.u32 %s1135_s1, 4  ;;  %s143_s23 = int_to_ptr.vmem [resolvable:$true] %s142_s23 }
   0xc   : > { %s1141_s18 = scalar_select %p812_p4, 1, 0 }
   0xd   : > { %s1142_s19 = scalar_select %p817_p6, 1, 0 }
   0xe   : > { %p822_p8 = pnand %p497_p5, %p120_p7  ;;  %s833_s24 = sadd.s32 1, %s747_s15  }
   0xf   : > { %s67_s26 = ssub.s32 %s747_s15, %s833_s24  ;;  %s70_s27 = sadd.s32 1, %s743_s14 }
  0x10   : > { %p551_p10 = pneg %p822_p8  ;;  %p844_p12 = scmp.eq.s32.totalorder %s67_s26, 0 }
  0x11   : > { %s615_s4 = scalar_lea.hbm %s1134_s0, 16 }
  0x12   : > { %p837_p11 = pnand %p551_p10, %p1138_p1  ;;  %p616_p13 = scmp.ne.s32.totalorder %s1134_s0, %s615_s4 }
  0x13   : > { %p622_p7 = scmp.lt.u32.totalorder %s615_s4, %s1134_s0 }
  0x14   : > { %p617_p0 = pneg %p837_p11 }
  0x16   : > { %p618_p3 = pnand %p617_p0, %p616_p13 }
  0x18   : > { %p619_p5 = pneg %p618_p3 }
  0x1a   : > { %p624_p10 = pnand %p622_p7, %p619_p5 }
  0x1c   : > { %627 = shalt.err (!%p624_p10)
}
  0x1d   : > { %s749_s9 = smov [#allocation2]   ;;  %s628_s17 = scalar_lea.vmem %s143_s23, 16 }
  0x1e   : > { %554 = dma.hbm_to_smem (!%p837_p11), %s1134_s0, 16, %s749_s9, [#allocation5]  }
  0x1f   : > { %p629_p9 = scmp.ne.s32.totalorder %s143_s23, %s628_s17  ;;  %p636_p6 = scmp.lt.s32.totalorder %s143_s23, %s143_s23 }
  0x20   : > { %p637_p13 = scmp.lt.s32.totalorder %s628_s17, %s628_s17 }
  0x21   : > { %p631_p1 = pnand %p629_p9, %p617_p0 }
  0x22   : > { %p638_p3 = por %p637_p13, %p636_p6 }
  0x23   : > { %p632_p2 = pneg %p631_p1 }
  0x25   : > { %p639_p4 = pnand %p638_p3, %p632_p2 }
  0x27   : > { %642 = shalt.err (!%p639_p4)
}
  0x28   : > { %s750_s21 = smov [#allocation7]   ;;  %p77_p1 = scmp.ne.s32.totalorder %s743_s14, %s739_s13 }
  0x29   : > { %557 = dma.vmem_to_smem (!%p837_p11), %s143_s23, 16, %s750_s21, [#allocation6]  }
  0x2a   : > { %s869_s22 = scalar_select %p844_p12, %s743_s14, %s70_s27  }
  0x2b   : > { %p78_p6 = scmp.eq.s32.totalorder %s747_s15, 0  ;;  %p568_p2 = scmp.lt.s32.totalorder %s747_s15, 2 }
  0x2c   : > { %s153_s26 = sand.u32 1, %s743_s14   ;;  %p1146_p9 = scmp.eq.s32.totalorder %s803_s16, 1 }
  0x2d   : > { %p79_p4 = por %p78_p6, %p77_p1  ;;  %s501_s29 = sshll.u32 %s153_s26, 4 }
  0x2e   : > { %p878_p0 = por %p1146_p9, %p77_p1  ;;  %s536_s30 = sshll.u32 %s747_s15, 8 }
  0x2f   : > { %s886_s6 = scalar_lea.hbm %s1136_s2, %s536_s30  ;;  %s157_s23 = scalar_lea.vmem [#allocation8], %s501_s29 }
  0x30   : > { %s1147_s25 = scalar_select %p878_p0, 1, 0 }
  0x31   : > { %s165_s27 = sshll.u32 %s157_s23, 4  ;;  %p890_p11 = pnand %p568_p2, %p79_p4  ;;  %s888_s27 = int_to_ptr.vmem [resolvable:$true] %s165_s27 }
  0x32   : > { %s154_s7 = scalar_lea.sflag [#allocation3], %s153_s26  ;;  %s643_s8 = scalar_lea.hbm %s886_s6, 256 }
  0x33   : > { %p644_p12 = scmp.ne.s32.totalorder %s886_s6, %s643_s8  ;;  %p645_p5 = pneg %p890_p11 }
  0x34   : > { %s648_s11 = scalar_lea.hbm %s1136_s2, 512  ;;  %p649_p13 = scmp.lt.u32.totalorder %s886_s6, %s1136_s2 }
  0x35   : > { %p646_p7 = pnand %p645_p5, %p644_p12  ;;  %p650_p3 = scmp.lt.u32.totalorder %s648_s11, %s643_s8 }
  0x36   : > { %p652_p6 = scmp.lt.u32.totalorder %s643_s8, %s886_s6 }
  0x37   : > { %p647_p10 = pneg %p646_p7  ;;  %p651_p1 = por %p650_p3, %p649_p13 }
  0x39   : > { %p653_p2 = por %p652_p6, %p651_p1 }
  0x3b   : > { %p654_p4 = pnand %p653_p2, %p647_p10 }
  0x3d   : > { %657 = shalt.err (!%p654_p4)
}
  0x3e   : > { %s658_s26 = scalar_lea.vmem %s888_s27, 256  ;;  %s751_s29 = smov [#allocation8]  }
  0x3f   : > { %p659_p9 = scmp.ne.s32.totalorder %s888_s27, %s658_s26  ;;  %s663_s30 = sshll.u32 %s751_s29, 4  ;;  %s664_s30 = int_to_ptr.vmem [resolvable:$false] %s663_s30 }
  0x40   : > { %s665_s4 = scalar_lea.vmem %s664_s30, 512  ;;  %p666_p0 = scmp.lt.s32.totalorder %s888_s27, %s664_s30 }
  0x41   : > { %p661_p12 = pnand %p659_p9, %p645_p5  ;;  %p667_p13 = scmp.lt.s32.totalorder %s665_s4, %s658_s26 }
  0x43   : > { %p662_p7 = pneg %p661_p12  ;;  %p668_p3 = por %p667_p13, %p666_p0 }
  0x45   : > { %p669_p1 = pnand %p668_p3, %p662_p7 }
  0x47   : > { %672 = shalt.err (!%p669_p1)
}
  0x48   : > { %561 = dma.hbm_to_vmem [thread:$0]  (!%p890_p11), %s886_s6, 256, %s888_s27, %s154_s7  }
  0x49   : > { %174 = sbr.rel (%p822_p8) target bundleno = 249 (0xf9), region = 32  ;;  %p1149_p5 = scmp.eq.s32.totalorder (!%p822_p8), %s803_s16, 0 }
  0x50   : > { %718 = dma.done.wait (%p1149_p5), [#allocation5], 16   ;;  %p1150_p10 = pmov %p1149_p5 }
  0x51   : > { %p1151_p6 = pmov %p1149_p5 }
  0x52   : > { %720 = vsyncadd (%p1150_p10), [#allocation5], 4294967280 }
  0x53   : > { %722 = dma.done.wait (%p1151_p6), [#allocation6], 16   ;;  %p1152_p0 = pmov %p1149_p5 }
  0x54   : > { %s930_s5 = sand.u32 1, %s739_s13   ;;  %p1153_p8 = scmp.ne.s32.totalorder %s1141_s18, 0 }
  0x55   : > { %724 = vsyncadd (%p1152_p0), [#allocation6], 4294967280  ;;  %s507_s20 = sshll.u32 %s930_s5, 4  ;;  %s185_s6 = scalar_lea.sflag [#allocation3], %s930_s5 }
  0x56   : > { %s188_s23 = scalar_lea.vmem [#allocation8], %s507_s20 }
  0x57   : > { %726 = dma.done.wait (%p1153_p8), %s185_s6, 256  }
  0x58   : > { %728 = vsyncadd (%p1153_p8), %s185_s6, 4294967040 }
  0x59   : > { %193 = sfence }
  0x5a   : > { %v938_v0 = vld [vmem:[%s188_s23] sm:$0xff]  ;;  %s217_s27 = sld [smem:[#allocation2]]  ;;  %s752_s7 = smov 1   ;;  %v942_v1 = vld [vmem:[%s188_s23 + $0x8] sm:$0xff]  ;;  %v214_v8 = vlaneseq }
  0x5b   : > { %s221_s28 = sld [smem:[#allocation7]]  ;;  %228 = vrot.lane.b32.xlu1 %v938_v0, %s752_s7  ;;  %s753_s8 = smov 3  }
  0x5c   : > { %335 = vrot.lane.b32.xlu0 %v938_v0, %s753_s8  ;;  %s754_s18 = smov 2   ;;  %s538_s9 = smul.u32 80, %s930_s5  ;;  %v969_v9 = vand.u32 127, %v214_v8 }
  0x5d   : > { %s755_s10 = smov 127   ;;  %s756_s17 = smov 126  }
  0x5e   : > { %s953_s11 = scalar_lea.vmem [#allocation9], %s538_s9  ;;  %s757_s21 = smov 125   ;;  %v986_v10 = vadd.s32 128, %v969_v9  ;;  %vm232_vm0 = vcmp.lt.s32.totalorder %v969_v9, 1  ;;  %vm235_vm1 = vcmp.ge.s32.totalorder %v969_v9, 1  ;;  %vm339_vm2 = vcmp.lt.s32.totalorder %v969_v9, 3 }
  0x5f   : > { %230 = vrot.lane.b32.xlu1 %v942_v1, %s752_s7  ;;  %s961_s26 = sld [smem:[#allocation2 + $0x2]]  ;;  %s963_s29 = sld [smem:[#allocation2 + $0x1]]  ;;  %vm342_vm3 = vcmp.ge.s32.totalorder %v969_v9, 3  ;;  %vm294_vm4 = vcmp.lt.s32.totalorder %v969_v9, 2  ;;  %vm297_vm5 = vcmp.ge.s32.totalorder %v969_v9, 2  ;;  %vm257_vm6 = vcmp.lt.s32.totalorder %v969_v9, 127 }
  0x60   : > { %v218_v2 = vstv %s217_s27  ;;  %337 = vrot.lane.b32.xlu0 %v942_v1, %s753_s8  ;;  %s965_s30 = sld [smem:[#allocation7 + $0x1]]  ;;  %s967_s4 = sld [smem:[#allocation2 + $0x4]]  ;;  %vm261_vm7 = vcmp.lt.s32.totalorder %v986_v10, 255  ;;  %vm319_vm8 = vcmp.lt.s32.totalorder %v969_v9, 126  ;;  %vm323_vm9 = vcmp.lt.s32.totalorder %v986_v10, 254 }
  0x61   : > { %v222_v3 = vstv %s221_s28  ;;  %v219_v4 = vmul.f32 %v218_v2, %v938_v0  ;;  %v220_v5 = vmul.f32 %v218_v2, %v942_v1  ;;  %s971_s20 = sld [smem:[#allocation7 + $0x2]]  ;;  %s975_s23 = sld [smem:[#allocation2 + $0x7]]  ;;  %vm370_vm10 = vcmp.lt.s32.totalorder %v969_v9, 125 }
  0x62   : > { %s973_s6 = sld [smem:[#allocation2 + $0xa]]  ;;  %s977_s27 = sld [smem:[#allocation2 + $0x9]]  ;;  %vm374_vm11 = vcmp.lt.s32.totalorder %v986_v10, 253 }
  0x63   : > { %v223_v6 = vadd.f32 %v222_v3, %v219_v4  ;;  %v224_v7 = vadd.f32 %v222_v3, %v220_v5  ;;  %292 = vrot.lane.b32.xlu1 %v942_v1, %s754_s18  ;;  %s979_s28 = sld [smem:[#allocation7 + $0x4]]  ;;  %s981_s7 = sld [smem:[#allocation2 + $0x6]] }
  0x64   : > { %290 = vrot.lane.b32.xlu0 %v938_v0, %s754_s18  ;;  %s983_s8 = sld [smem:[#allocation7 + $0x3]]  ;;  %s997_s9 = sld [smem:[#allocation2 + $0x5]] }
  0x65   : > { %225 = vst [vmem:[%s953_s11] sm:$0xff] %v223_v6  ;;  %226 = vst [vmem:[%s953_s11 + $0x8] sm:$0xff] %v224_v7  ;;  %s989_s18 = sld [smem:[#allocation2 + $0x3]]  ;;  %v247_v13 = vstv %s961_s26  ;;  %v239_v14 = vstv %s963_s29  ;;  %s537_s26 = sshll.u32 %s803_s16, 8 }
  0x66   : > { %v243_v15 = vstv %s965_s30  ;;  %v249_v16 = vmul.f32 %v247_v13, %v942_v1  ;;  %v273_v17 = vstv %s967_s4  ;;  %v248_v25 = vmul.f32 %v247_v13, %v938_v0  ;;  %s399_s29 = sshll.u32 %s953_s11, 4  ;;  %s1085_s4 = scalar_lea.hbm %s1137_s3, %s537_s26  ;;  %s1088_s29 = int_to_ptr.vmem [resolvable:$true] %s399_s29 }
  0x67   : > { %255 = vrot.lane.b32.xlu1 %v942_v1, %s755_s10  ;;  %v277_v18 = vstv %s971_s20  ;;  %v309_v24 = vstv %s975_s23  ;;  %s386_s20 = scalar_lea.sflag [#allocation4], %s930_s5  ;;  %p1154_p2 = scmp.ne.s32.totalorder %s1147_s25, 0 }
  0x68   : > { %253 = vrot.lane.b32.xlu0 %v938_v0, %s755_s10  ;;  %s999_s10 = sld [smem:[#allocation2 + $0xb]]  ;;  %v354_v19 = vstv %s973_s6  ;;  %v346_v27 = vstv %s977_s27  ;;  %v311_v37 = vmul.f32 %v309_v24, %v942_v1  ;;  %v310_v47 = vmul.f32 %v309_v24, %v938_v0  ;;  %s673_s6 = scalar_lea.vmem %s1088_s29, 1280 }
  0x69   : > { %v350_v28 = vstv %s979_s28  ;;  %v301_v32 = vstv %s981_s7  ;;  %p674_p11 = scmp.ne.s32.totalorder %s1088_s29, %s673_s6  ;;  %s758_s23 = smov [#allocation9]  }
  0x6a   : > { %v305_v33 = vstv %s983_s8  ;;  %v281_v45 = vstv %s997_s9  ;;  %s677_s27 = sshll.u32 %s758_s23, 4  ;;  %s678_s27 = int_to_ptr.vmem [resolvable:$false] %s677_s27 }
  0x6b   : > { %317 = vrot.lane.b32.xlu1 %v942_v1, %s756_s17  ;;  %v264_v39 = vstv %s989_s18  ;;  %p675_p4 = pnand %p674_p11, %p1154_p2  ;;  %s679_s28 = scalar_lea.vmem %s678_s27, 2560 }
  0x6c   : > { %315 = vrot.lane.b32.xlu0 %v938_v0, %s756_s17  ;;  %s1005_s17 = sld [smem:[#allocation2 + $0x8]]  ;;  %p680_p12 = scmp.lt.s32.totalorder %s1088_s29, %s678_s27 }
  0x6d   : > { %p676_p9 = pneg %p675_p4  ;;  %p681_p7 = scmp.lt.s32.totalorder %s679_s28, %s673_s6 }
  0x6e   : > { %v360_v46 = vstv %s999_s10 }
  0x6f   : > { %368 = vrot.lane.b32.xlu1 %v942_v1, %s757_s21  ;;  %p682_p13 = por %p681_p7, %p680_p12 }
  0x70   : > { %366 = vrot.lane.b32.xlu0 %v938_v0, %s757_s21  ;;  %s1048_s21 = sld [smem:[#allocation2 + $0xc]] }
  0x71   : > { %p683_p3 = pnand %p682_p13, %p676_p9 }
  0x72   : > { %v326_v51 = vstv %s1005_s17 }
  0xcd   : > { %v229_v11 = vpop.permute.xlu1 %228 }
  0xce   : > { %v336_v12 = vpop.permute.xlu0 %335 }
  0xd1   : > { %v231_v20 = vpop.permute.xlu1 %230 }
  0xd2   : > { %v338_v21 = vpop.permute.xlu0 %337  ;;  %v1013_v22 = vsel %vm232_vm0, %v229_v11, %v231_v20  ;;  %v234_v23 = vsel %vm232_vm0, %v231_v20, %v229_v11 }
  0xd3   : > { %v237_v26 = vsel %vm235_vm1, %v234_v23, 0.0  ;;  %v341_v29 = vsel %vm339_vm2, %v338_v21, %v336_v12  ;;  %v241_v31 = vmul.f32 %v239_v14, %v1013_v22  ;;  %v340_v35 = vsel %vm339_vm2, %v336_v12, %v338_v21 }
  0xd4   : > { %v240_v30 = vmul.f32 %v239_v14, %v237_v26  ;;  %v274_v34 = vmul.f32 %v273_v17, %v237_v26  ;;  %v344_v41 = vsel %vm342_vm3, %v341_v29, 0.0  ;;  %v275_v49 = vmul.f32 %v273_v17, %v1013_v22 }
  0xd5   : > { %v293_v36 = vpop.permute.xlu1 %292  ;;  %v245_v48 = vadd.f32 %v243_v15, %v241_v31  ;;  %v355_v52 = vmul.f32 %v354_v19, %v237_v26  ;;  %v347_v53 = vmul.f32 %v346_v27, %v344_v41  ;;  %v348_v54 = vmul.f32 %v346_v27, %v340_v35 }
  0xd6   : > { %v291_v38 = vpop.permute.xlu0 %290  ;;  %v244_v40 = vadd.f32 %v243_v15, %v240_v30  ;;  %v278_v58 = vadd.f32 %v277_v18, %v274_v34  ;;  %v279_v3 = vadd.f32 %v277_v18, %v275_v49  ;;  %v356_v24 = vmul.f32 %v354_v19, %v1013_v22 }
  0xd7   : > { %v295_v42 = vsel %vm294_vm4, %v291_v38, %v293_v36  ;;  %v296_v43 = vsel %vm294_vm4, %v293_v36, %v291_v38  ;;  %v251_v2 = vadd.f32 %v249_v16, %v245_v48  ;;  %v351_v6 = vadd.f32 %v350_v28, %v347_v53 }
  0xd8   : > { %v299_v44 = vsel %vm297_vm5, %v296_v43, 0.0  ;;  %v303_v55 = vmul.f32 %v301_v32, %v295_v42  ;;  %v250_v59 = vadd.f32 %v248_v25, %v244_v40  ;;  %v352_v14 = vadd.f32 %v350_v28, %v348_v54 }
  0xd9   : > { %v302_v50 = vmul.f32 %v301_v32, %v299_v44  ;;  %v256_v56 = vpop.permute.xlu1 %255  ;;  %v377_v27 = vstv %s1048_s21  ;;  %v357_v28 = vadd.f32 %v355_v52, %v351_v6 }
  0xda   : > { %v254_v57 = vpop.permute.xlu0 %253  ;;  %v307_v7 = vadd.f32 %v305_v33, %v303_v55  ;;  %v358_v34 = vadd.f32 %v356_v24, %v352_v14 }
  0xdb   : > { %v258_v60 = vsel %vm257_vm6, %v254_v57, %v256_v56  ;;  %v259_v61 = vsel %vm257_vm6, %v256_v56, %v254_v57  ;;  %v306_v62 = vadd.f32 %v305_v33, %v302_v50 }
  0xdc   : > { %v263_v63 = vsel %vm261_vm7, %v259_v61, 0.0  ;;  %v265_v0 = vmul.f32 %v264_v39, %v258_v60  ;;  %v282_v1 = vmul.f32 %v281_v45, %v258_v60  ;;  %v361_v16 = vmul.f32 %v360_v46, %v258_v60 }
  0xdd   : > { %v266_v4 = vmul.f32 %v264_v39, %v263_v63  ;;  %v283_v5 = vmul.f32 %v281_v45, %v263_v63  ;;  %v318_v12 = vpop.permute.xlu1 %317  ;;  %v312_v18 = vadd.f32 %v310_v47, %v306_v62  ;;  %v362_v25 = vmul.f32 %v360_v46, %v263_v63 }
  0xde   : > { %v267_v8 = vadd.f32 %v265_v0, %v250_v59  ;;  %v284_v11 = vadd.f32 %v282_v1, %v278_v58  ;;  %v316_v13 = vpop.permute.xlu0 %315  ;;  %v313_v29 = vadd.f32 %v311_v37, %v307_v7  ;;  %v363_v35 = vadd.f32 %v361_v16, %v357_v28 }
  0xdf   : > { %v268_v15 = vadd.f32 %v266_v4, %v251_v2  ;;  %v285_v17 = vadd.f32 %v283_v5, %v279_v3  ;;  %v320_v20 = vsel %vm319_vm8, %v316_v13, %v318_v12  ;;  %v321_v21 = vsel %vm319_vm8, %v318_v12, %v316_v13 }
  0xe0   : > { %512 = vst [vmem:[%s953_s11 + $0x10] sm:$0xff] %v267_v8  ;;  %517 = vst [vmem:[%s953_s11 + $0x20] sm:$0xff] %v284_v11  ;;  %v327_v23 = vmul.f32 %v326_v51, %v320_v20  ;;  %v325_v26 = vsel %vm323_vm9, %v321_v21, 0.0  ;;  %v364_v39 = vadd.f32 %v362_v25, %v358_v34 }
  0xe1   : > { %513 = vst [vmem:[%s953_s11 + $0x18] sm:$0xff] %v268_v15  ;;  %518 = vst [vmem:[%s953_s11 + $0x28] sm:$0xff] %v285_v17  ;;  %v328_v30 = vmul.f32 %v326_v51, %v325_v26  ;;  %v369_v32 = vpop.permute.xlu1 %368 }
  0xe2   : > { %v329_v31 = vadd.f32 %v327_v23, %v312_v18  ;;  %v367_v33 = vpop.permute.xlu0 %366 }
  0xe3   : > { %v371_v19 = vsel %vm370_vm10, %v367_v33, %v369_v32  ;;  %v372_v22 = vsel %vm370_vm10, %v369_v32, %v367_v33  ;;  %v330_v36 = vadd.f32 %v328_v30, %v313_v29 }
  0xe4   : > { %523 = vst [vmem:[%s953_s11 + $0x30] sm:$0xff] %v329_v31  ;;  %v376_v37 = vsel %vm374_vm11, %v372_v22, 0.0  ;;  %v378_v38 = vmul.f32 %v377_v27, %v371_v19 }
  0xe5   : > { %v379_v40 = vmul.f32 %v377_v27, %v376_v37  ;;  %524 = vst [vmem:[%s953_s11 + $0x38] sm:$0xff] %v330_v36 }
  0xe6   : > { %v380_v9 = vadd.f32 %v378_v38, %v363_v35 }
  0xe7   : > { %v381_v41 = vadd.f32 %v379_v40, %v364_v39 }
  0xe8   : > { %530 = vst [vmem:[%s953_s11 + $0x40] sm:$0xff] %v380_v9 }
  0xe9   : > { %531 = vst [vmem:[%s953_s11 + $0x48] sm:$0xff] %v381_v41 }
  0xea   : > { %686 = shalt.err (!%p683_p3)
}
  0xeb   : > { %s687_s11 = scalar_lea.hbm %s1085_s4, 1280  ;;  %s691_s18 = scalar_lea.hbm %s1137_s3, 2560 }
  0xec   : > { %p688_p1 = scmp.ne.s32.totalorder %s1085_s4, %s687_s11  ;;  %p692_p6 = scmp.lt.u32.totalorder %s1085_s4, %s1137_s3 }
  0xed   : > { %p693_p0 = scmp.lt.u32.totalorder %s691_s18, %s687_s11  ;;  %p695_p11 = scmp.lt.u32.totalorder %s687_s11, %s1085_s4 }
  0xee   : > { %p689_p5 = pnand %p688_p1, %p1154_p2 }
  0xef   : > { %p694_p8 = por %p693_p0, %p692_p6 }
  0xf0   : > { %p690_p10 = pneg %p689_p5 }
  0xf1   : > { %p696_p4 = por %p695_p11, %p694_p8 }
  0xf3   : > { %p697_p9 = pnand %p696_p4, %p690_p10 }
  0xf5   : > { %700 = shalt.err (!%p697_p9)
}
  0xf6   : > { %s759_s17 = smov 256   ;;  %s760_s21 = smov 512  }
  0xf7   : > { %s761_s26 = smov 16  }
  0xf8   : > { %549 = dma.vmem_to_hbm [thread:$0]  (%p1154_p2), %s1088_s29, 1280, %s1085_s4, %s386_s20, %s759_s17, %s760_s21, %s761_s26  }
  0xf9 PF: > { %s414_s16 = sand.u32 1, %s735_s12   ;;  %p1155_p12 = scmp.ne.s32.totalorder %s1142_s19, 0 }
  0xfa   : > { %p1156_p7 = scmp.ge.s32.totalorder %s747_s15, 2  ;;  %s415_s30 = scalar_lea.sflag [#allocation4], %s414_s16 }
  0xfc   : > { %p563_p13 = pnand %p1156_p7, %p1155_p12 }
  0xfe   : > { %730 = dma.done.wait (!%p563_p13), %s415_s30, 1280  }
  0xff   : > { %732 = vsyncadd (!%p563_p13), %s415_s30, 4294966016  ;;  %p18_p3 = scmp.ge.s32.totalorder %s833_s24, 4   ;;  %s1157_s12 = smov %s739_s13 }
 0x100   : > { %s1158_s13 = smov %s743_s14  ;;  %s1159_s14 = smov %s869_s22 }
 0x101   : > { %s1160_s15 = smov %s833_s24  ;;  %20 = sbr.rel (!%p18_p3) target bundleno = 7 (0x7), region = 91 }
 0x108   :  { %420 = vsyncpa [#allocation3], 1 }
 0x109   :  { %422 = vsyncpa [#allocation3 + $0x1], 1 }
 0x10a   :  { %423 = vsyncpa [#allocation4], 1 }
 0x10b   :  { %425 = vsyncpa [#allocation4 + $0x1], 1 }
 0x10c   :  { %426 = vsyncpa [#allocation5], 1 }
 0x10d   :  { %428 = vsyncpa [#allocation5 + $0x1], 1 }
 0x10e   :  { %429 = vsyncpa [#allocation6], 1 }
 0x10f   :  { %431 = vsyncpa [#allocation6 + $0x1], 1 }

</bundles_post_ra>
